<compile_context>
chip_gen: v7x
topology: tpu7x:2x2x1
jax: 0.10.0
libtpu: 0.0.40
codegen_flags: <defaults>
</compile_context>

<pallas_src>
import math

import jax
import jax.numpy as jnp
from jax.experimental import pallas as pl
from jax.experimental.pallas import tpu as pltpu


def convkb_kernel(x_ref, w_ref, b_ref, fc_ref, out_ref):
    # x_ref  : (3, H, Bt)  f32 VMEM   h/r/t slabs; hidden on sublanes, batch on lanes
    # w_ref  : (3K, C)     f32 SMEM   BN-folded conv weights, tap t = wi*K + k
    # b_ref  : (C,)        f32 SMEM   BN-folded conv bias (scalar per channel)
    # fc_ref : (C, P, 1)   f32 VMEM   fc weights in torch's c-major .view order,
    #                                 P on sublanes (lane-broadcast over batch)
    # out_ref: (1, Bt)     f32 VMEM   lane-dense scores for this batch tile
    _, H, Bt = x_ref.shape
    C, P, _ = fc_ref.shape
    K = H - P + 1

    # Hoist the 3K shifted input slabs out of the channel loop: each (possibly
    # sublane-misaligned) slice is materialized once per grid step, not once
    # per channel.  tap[wi*K + k][p, b] = x[wi, p + k, b].
    taps = [x_ref[wi, k:k + P, :] for wi in range(3) for k in range(K)]     # 3K x (P, Bt)

    # Channel-outer accumulation: only one (P, Bt) conv accumulator and the
    # running (P, Bt) fc partial are live (never a (C, P, Bt) tensor).
    # NOTE: on v6e/v7x the tap multiplies could run in bf16 (cast taps/weights,
    # keep these f32 accumulators) for ~2x VALU throughput; kept f32 here.
    s_pb = jnp.zeros((P, Bt), jnp.float32)
    for c in range(C):
        conv_c = w_ref[0, c] * taps[0]
        for t in range(1, 3 * K):
            conv_c = conv_c + w_ref[t, c] * taps[t]
        act_c = jnp.maximum(conv_c + b_ref[c], 0.0)       # bias + ReLU (dropout = identity in eval)
        s_pb = s_pb + act_c * fc_ref[c]                   # (P, 1) lane-broadcast over batch
    # One cross-sublane reduction at the end; lane-dense (1, Bt) store.
    out_ref[...] = -jnp.sum(s_pb, axis=0, keepdims=True)


def _round_up(n, m):
    return ((n + m - 1) // m) * m


def _choose_block_b(B, block_b):
    # Small batches: a single grid step sized to B (8-rounded) minimizes padded
    # lanes and the ~0.35us/step overhead.  Larger batches: lane-aligned tiles
    # sized FROM B (not a fixed 512) so the padded tail stays small, with >= 2
    # steps so both v7x TensorCores get work on the "parallel" axis.
    if B <= 256:
        return _round_up(B, 8)
    n_steps = max(2, pl.cdiv(B, block_b))
    return _round_up(pl.cdiv(B, n_steps), 128)


def convkb_score(x_t, w_taps, b_vec, fc3d, *, block_b=512, vmem_limit_bytes=None):
    """x_t: (3, H, B) f32 triple embedding slabs; returns (B,) f32 scores.

    VMEM budget per grid step (channel-outer kernel, nothing (C,P,Bt)-sized is
    ever live): ~ (3K + 2) * P * bb * 4 bytes of temporaries plus the
    double-buffered 2 * 3 * H * bb * 4 input block -- comfortably inside the
    32 MiB default scoped limit (and v7x's 64 MiB physical VMEM) even at
    bb = 512, H ~ 200, so vmem_limit_bytes normally stays at the default.
    """
    _, H, B = x_t.shape
    C, P, _ = fc3d.shape
    n_taps = w_taps.shape[0]
    assert n_taps == 3 * (H - P + 1)

    bb = _choose_block_b(B, block_b)
    Bp = _round_up(B, bb)
    if Bp != B:
        x_t = jnp.pad(x_t, ((0, 0), (0, 0), (0, Bp - B)))

    out = pl.pallas_call(
        convkb_kernel,
        out_shape=jax.ShapeDtypeStruct((1, Bp), jnp.float32),
        grid_spec=pltpu.PrefetchScalarGridSpec(
            num_scalar_prefetch=0,
            grid=(Bp // bb,),
            in_specs=[
                pl.BlockSpec((3, H, bb), lambda i: (0, 0, i)),
                pl.BlockSpec(memory_space=pltpu.MemorySpace.SMEM),   # (3K, C) tap weight scalars
                pl.BlockSpec(memory_space=pltpu.MemorySpace.SMEM),   # (C,)   bias scalars
                pl.BlockSpec((C, P, 1), lambda i: (0, 0, 0)),        # fc, P on sublanes
            ],
            out_specs=pl.BlockSpec((1, bb), lambda i: (0, i)),
        ),
        compiler_params=pltpu.CompilerParams(
            dimension_semantics=("parallel",),
            vmem_limit_bytes=vmem_limit_bytes,
        ),
    )(x_t, w_taps, b_vec, fc3d)
    return out[0, :B]


def fold_batchnorms(conv_w, conv_b, bn1, bn2, eps=1e-5):
    """Fold inference-mode BN1 (pre-conv) and BN2 (post-conv) into conv weights/bias."""
    g1, be1, m1, v1 = bn1                      # shapes (1,)
    scale1 = g1 / jnp.sqrt(v1 + eps)
    shift1 = be1 - m1 * scale1
    g2, be2, m2, v2 = bn2                      # shapes (C,)
    scale2 = g2 / jnp.sqrt(v2 + eps)
    shift2 = be2 - m2 * scale2
    w_sum = conv_w.reshape(conv_w.shape[0], -1).sum(axis=1)          # (C,)
    w_eff = (scale2[:, None, None, None] * scale1) * conv_w          # (C,1,K,3)
    b_eff = scale2 * (conv_b + shift1 * w_sum) + shift2              # (C,)
    return w_eff, b_eff


def prep_kernel_params(conv_w, conv_b, bn1, bn2, fc_w, hidden_size, eps=1e-5):
    """BN fold + reshape parameters into the kernel's SMEM/VMEM layouts."""
    C, _, K, _ = conv_w.shape
    P = hidden_size - K + 1
    w_eff, b_eff = fold_batchnorms(conv_w, conv_b, bn1, bn2, eps)
    # tap index t = wi*K + k  <->  conv weight W[c, 0, k, wi]; small scalar
    # table kept in SMEM -> no lane-replicated weight tensor, no per-tap relayout.
    w_taps = jnp.transpose(w_eff[:, 0, :, :], (2, 1, 0)).reshape(3 * K, C).astype(jnp.float32)
    b_vec = b_eff.astype(jnp.float32)                                 # (C,)
    # fc weights in torch's c-major .view order with P on the SUBLANE axis
    # (last dim 1 -> lanes), so each channel's row lane-broadcasts over batch.
    fc3d = fc_w.reshape(C, P)[:, :, None].astype(jnp.float32)         # (C, P, 1)
    return w_taps, b_vec, fc3d


def reference_convkb(x, conv_w, conv_b, bn1, bn2, fc_w, eps=1e-5):
    """Pure-JAX replica of the PyTorch forward (inference mode) for checking. x: (B,3,H)."""
    B, _, H = x.shape
    C, _, K, _ = conv_w.shape
    P = H - K + 1
    ci = jnp.transpose(x, (0, 2, 1))                                  # (B, H, 3)
    g1, be1, m1, v1 = bn1
    ci = (ci - m1) / jnp.sqrt(v1 + eps) * g1 + be1
    out = jnp.zeros((B, C, P), jnp.float32)
    for k in range(K):
        out = out + jnp.einsum("bpw,cw->bcp", ci[:, k:k + P, :], conv_w[:, 0, k, :])
    out = out + conv_b[None, :, None]
    g2, be2, m2, v2 = bn2
    out = (out - m2[None, :, None]) / jnp.sqrt(v2 + eps)[None, :, None] * g2[None, :, None] \
          + be2[None, :, None]
    out = jnp.maximum(out, 0.0)
    flat = out.reshape(B, C * P)                                      # c-major then p, like torch .view
    return -(flat @ fc_w[0])


if __name__ == "__main__":
    # Small, module-consistent shapes.
    entTotal, relTotal = 40, 12
    hidden_size, out_channels, kernel_size = 32, 4, 2
    B = 16
    P = hidden_size - kernel_size + 1

    key = jax.random.PRNGKey(0)
    k_ent, k_rel, k_conv, k_cb, k_fc, k_h, k_r, k_t = jax.random.split(key, 8)

    def xavier(k, shape, fan_in, fan_out):
        bound = math.sqrt(6.0 / (fan_in + fan_out))
        return jax.random.uniform(k, shape, jnp.float32, -bound, bound)

    # Deterministic parameter init (mirrors nn.init.xavier_uniform_ shapes).
    ent_emb = xavier(k_ent, (entTotal, hidden_size), hidden_size, entTotal)
    rel_emb = xavier(k_rel, (relTotal, hidden_size), hidden_size, relTotal)
    conv_w = xavier(k_conv, (out_channels, 1, kernel_size, 3),
                    1 * kernel_size * 3, out_channels * kernel_size * 3)
    cb_bound = 1.0 / math.sqrt(1 * kernel_size * 3)
    conv_b = jax.random.uniform(k_cb, (out_channels,), jnp.float32, -cb_bound, cb_bound)
    fc_w = xavier(k_fc, (1, P * out_channels), P * out_channels, 1)

    # BatchNorm params: PyTorch init defaults, inference mode.
    bn1 = (jnp.ones((1,)), jnp.zeros((1,)), jnp.zeros((1,)), jnp.ones((1,)))
    bn2 = (jnp.ones((out_channels,)), jnp.zeros((out_channels,)),
           jnp.zeros((out_channels,)), jnp.ones((out_channels,)))

    # Inputs (index triples).
    batch_h = jax.random.randint(k_h, (B,), 0, entTotal)
    batch_r = jax.random.randint(k_r, (B,), 0, relTotal)
    batch_t = jax.random.randint(k_t, (B,), 0, entTotal)

    # Glue (XLA): gather embeddings straight into the kernel's (3, H, B) layout
    # from pre-transposed (H, E) tables -- no (B,3,H)->(3,H,B) transpose of the
    # gathered activations.
    # TODO(synk): the embedding gather stays in XLA; a scalar-prefetch DMA
    # gather in the kernel is unnecessary at these sizes.
    ent_t = ent_emb.T                                     # (H, E), one-time table transpose
    rel_t = rel_emb.T
    h_hb = ent_t[:, batch_h]                              # (H, B)
    r_hb = rel_t[:, batch_r]
    t_hb = ent_t[:, batch_t]
    x_t = jnp.stack([h_hb, r_hb, t_hb], axis=0)           # (3, H, B) kernel layout

    w_taps, b_vec, fc3d = prep_kernel_params(conv_w, conv_b, bn1, bn2, fc_w, hidden_size)

    score = convkb_score(x_t, w_taps, b_vec, fc3d)
    score = jax.block_until_ready(score)

    x_b3h = jnp.transpose(x_t, (2, 0, 1))                 # (B, 3, H) for the reference
    ref = reference_convkb(x_b3h, conv_w, conv_b, bn1, bn2, fc_w)
    assert score.shape == (B,)
    assert jnp.allclose(score, ref, rtol=1e-4, atol=3e-5), (score, ref)

    print("KERNEL_OK")
</pallas_src>

<mosaic_0001>
module attributes {stable_mosaic.version = 11 : i64} {
  func.func @convkb_kernel(%arg0: i32, %arg1: memref<3x32x16xf32, #tpu.memory_space<vmem>>, %arg2: memref<6x4xf32, #tpu.memory_space<smem>>, %arg3: memref<4xf32, #tpu.memory_space<smem>>, %arg4: memref<4x31x1xf32, #tpu.memory_space<vmem>>, %arg5: memref<1x16xf32, #tpu.memory_space<vmem>>) attributes {dimension_semantics = [#tpu.dimension_semantics<parallel>], iteration_bounds = array<i64: 1>, scalar_prefetch = 0 : i64, scratch_operands = 0 : i64, tpu.core_type = #tpu.core_type<tc>, window_params = [{transform_indices = @transform_0, window_bounds = array<i64: 3, 32, 16>}, {transform_indices = @transform_1, window_bounds = array<i64: 6, 4>}, {transform_indices = @transform_2, window_bounds = array<i64: 4>}, {pipeline_mode = #tpu.pipeline_mode<synchronous>, transform_indices = @transform_3, window_bounds = array<i64: 4, 31, 1>}, {transform_indices = @transform_4, window_bounds = array<i64: 1, 16>}]} {
    %c0 = arith.constant 0 : index
    %c0_0 = arith.constant 0 : index
    %c0_1 = arith.constant 0 : index
    %0 = vector.load %arg1[%c0, %c0_0, %c0_1] : memref<3x32x16xf32, #tpu.memory_space<vmem>>, vector<1x31x16xf32>
    %1 = vector.shape_cast %0 : vector<1x31x16xf32> to vector<31x16xf32>
    %c0_2 = arith.constant 0 : index
    %c1 = arith.constant 1 : index
    %c0_3 = arith.constant 0 : index
    %2 = vector.load %arg1[%c0_2, %c1, %c0_3] : memref<3x32x16xf32, #tpu.memory_space<vmem>>, vector<1x31x16xf32>
    %3 = vector.shape_cast %2 : vector<1x31x16xf32> to vector<31x16xf32>
    %c1_4 = arith.constant 1 : index
    %c0_5 = arith.constant 0 : index
    %c0_6 = arith.constant 0 : index
    %4 = vector.load %arg1[%c1_4, %c0_5, %c0_6] : memref<3x32x16xf32, #tpu.memory_space<vmem>>, vector<1x31x16xf32>
    %5 = vector.shape_cast %4 : vector<1x31x16xf32> to vector<31x16xf32>
    %c1_7 = arith.constant 1 : index
    %c1_8 = arith.constant 1 : index
    %c0_9 = arith.constant 0 : index
    %6 = vector.load %arg1[%c1_7, %c1_8, %c0_9] : memref<3x32x16xf32, #tpu.memory_space<vmem>>, vector<1x31x16xf32>
    %7 = vector.shape_cast %6 : vector<1x31x16xf32> to vector<31x16xf32>
    %c2 = arith.constant 2 : index
    %c0_10 = arith.constant 0 : index
    %c0_11 = arith.constant 0 : index
    %8 = vector.load %arg1[%c2, %c0_10, %c0_11] : memref<3x32x16xf32, #tpu.memory_space<vmem>>, vector<1x31x16xf32>
    %9 = vector.shape_cast %8 : vector<1x31x16xf32> to vector<31x16xf32>
    %c2_12 = arith.constant 2 : index
    %c1_13 = arith.constant 1 : index
    %c0_14 = arith.constant 0 : index
    %10 = vector.load %arg1[%c2_12, %c1_13, %c0_14] : memref<3x32x16xf32, #tpu.memory_space<vmem>>, vector<1x31x16xf32>
    %11 = vector.shape_cast %10 : vector<1x31x16xf32> to vector<31x16xf32>
    %cst = arith.constant 0.000000e+00 : f32
    %12 = vector.broadcast %cst : f32 to vector<31x16xf32>
    %c0_15 = arith.constant 0 : index
    %c0_16 = arith.constant 0 : index
    %13 = memref.load %arg2[%c0_15, %c0_16] : memref<6x4xf32, #tpu.memory_space<smem>>
    %14 = vector.broadcast %13 : f32 to vector<31x16xf32>
    %15 = arith.mulf %14, %1 : vector<31x16xf32>
    %c1_17 = arith.constant 1 : index
    %c0_18 = arith.constant 0 : index
    %16 = memref.load %arg2[%c1_17, %c0_18] : memref<6x4xf32, #tpu.memory_space<smem>>
    %17 = vector.broadcast %16 : f32 to vector<31x16xf32>
    %18 = arith.mulf %17, %3 : vector<31x16xf32>
    %19 = arith.addf %15, %18 : vector<31x16xf32>
    %c2_19 = arith.constant 2 : index
    %c0_20 = arith.constant 0 : index
    %20 = memref.load %arg2[%c2_19, %c0_20] : memref<6x4xf32, #tpu.memory_space<smem>>
    %21 = vector.broadcast %20 : f32 to vector<31x16xf32>
    %22 = arith.mulf %21, %5 : vector<31x16xf32>
    %23 = arith.addf %19, %22 : vector<31x16xf32>
    %c3 = arith.constant 3 : index
    %c0_21 = arith.constant 0 : index
    %24 = memref.load %arg2[%c3, %c0_21] : memref<6x4xf32, #tpu.memory_space<smem>>
    %25 = vector.broadcast %24 : f32 to vector<31x16xf32>
    %26 = arith.mulf %25, %7 : vector<31x16xf32>
    %27 = arith.addf %23, %26 : vector<31x16xf32>
    %c4 = arith.constant 4 : index
    %c0_22 = arith.constant 0 : index
    %28 = memref.load %arg2[%c4, %c0_22] : memref<6x4xf32, #tpu.memory_space<smem>>
    %29 = vector.broadcast %28 : f32 to vector<31x16xf32>
    %30 = arith.mulf %29, %9 : vector<31x16xf32>
    %31 = arith.addf %27, %30 : vector<31x16xf32>
    %c5 = arith.constant 5 : index
    %c0_23 = arith.constant 0 : index
    %32 = memref.load %arg2[%c5, %c0_23] : memref<6x4xf32, #tpu.memory_space<smem>>
    %33 = vector.broadcast %32 : f32 to vector<31x16xf32>
    %34 = arith.mulf %33, %11 : vector<31x16xf32>
    %35 = arith.addf %31, %34 : vector<31x16xf32>
    %c0_24 = arith.constant 0 : index
    %36 = memref.load %arg3[%c0_24] : memref<4xf32, #tpu.memory_space<smem>>
    %37 = vector.broadcast %36 : f32 to vector<31x16xf32>
    %38 = arith.addf %35, %37 : vector<31x16xf32>
    %cst_25 = arith.constant 0.000000e+00 : f32
    %39 = vector.broadcast %cst_25 : f32 to vector<31x16xf32>
    %40 = arith.maximumf %38, %39 : vector<31x16xf32>
    %c0_26 = arith.constant 0 : index
    %c0_27 = arith.constant 0 : index
    %c0_28 = arith.constant 0 : index
    %41 = vector.load %arg4[%c0_26, %c0_27, %c0_28] : memref<4x31x1xf32, #tpu.memory_space<vmem>>, vector<1x31x1xf32>
    %42 = vector.shape_cast %41 : vector<1x31x1xf32> to vector<31x1xf32>
    %43 = vector.broadcast %42 : vector<31x1xf32> to vector<31x16xf32>
    %44 = arith.mulf %40, %43 : vector<31x16xf32>
    %45 = arith.addf %12, %44 : vector<31x16xf32>
    %c0_29 = arith.constant 0 : index
    %c1_30 = arith.constant 1 : index
    %46 = memref.load %arg2[%c0_29, %c1_30] : memref<6x4xf32, #tpu.memory_space<smem>>
    %47 = vector.broadcast %46 : f32 to vector<31x16xf32>
    %48 = arith.mulf %47, %1 : vector<31x16xf32>
    %c1_31 = arith.constant 1 : index
    %c1_32 = arith.constant 1 : index
    %49 = memref.load %arg2[%c1_31, %c1_32] : memref<6x4xf32, #tpu.memory_space<smem>>
    %50 = vector.broadcast %49 : f32 to vector<31x16xf32>
    %51 = arith.mulf %50, %3 : vector<31x16xf32>
    %52 = arith.addf %48, %51 : vector<31x16xf32>
    %c2_33 = arith.constant 2 : index
    %c1_34 = arith.constant 1 : index
    %53 = memref.load %arg2[%c2_33, %c1_34] : memref<6x4xf32, #tpu.memory_space<smem>>
    %54 = vector.broadcast %53 : f32 to vector<31x16xf32>
    %55 = arith.mulf %54, %5 : vector<31x16xf32>
    %56 = arith.addf %52, %55 : vector<31x16xf32>
    %c3_35 = arith.constant 3 : index
    %c1_36 = arith.constant 1 : index
    %57 = memref.load %arg2[%c3_35, %c1_36] : memref<6x4xf32, #tpu.memory_space<smem>>
    %58 = vector.broadcast %57 : f32 to vector<31x16xf32>
    %59 = arith.mulf %58, %7 : vector<31x16xf32>
    %60 = arith.addf %56, %59 : vector<31x16xf32>
    %c4_37 = arith.constant 4 : index
    %c1_38 = arith.constant 1 : index
    %61 = memref.load %arg2[%c4_37, %c1_38] : memref<6x4xf32, #tpu.memory_space<smem>>
    %62 = vector.broadcast %61 : f32 to vector<31x16xf32>
    %63 = arith.mulf %62, %9 : vector<31x16xf32>
    %64 = arith.addf %60, %63 : vector<31x16xf32>
    %c5_39 = arith.constant 5 : index
    %c1_40 = arith.constant 1 : index
    %65 = memref.load %arg2[%c5_39, %c1_40] : memref<6x4xf32, #tpu.memory_space<smem>>
    %66 = vector.broadcast %65 : f32 to vector<31x16xf32>
    %67 = arith.mulf %66, %11 : vector<31x16xf32>
    %68 = arith.addf %64, %67 : vector<31x16xf32>
    %c1_41 = arith.constant 1 : index
    %69 = memref.load %arg3[%c1_41] : memref<4xf32, #tpu.memory_space<smem>>
    %70 = vector.broadcast %69 : f32 to vector<31x16xf32>
    %71 = arith.addf %68, %70 : vector<31x16xf32>
    %cst_42 = arith.constant 0.000000e+00 : f32
    %72 = vector.broadcast %cst_42 : f32 to vector<31x16xf32>
    %73 = arith.maximumf %71, %72 : vector<31x16xf32>
    %c1_43 = arith.constant 1 : index
    %c0_44 = arith.constant 0 : index
    %c0_45 = arith.constant 0 : index
    %74 = vector.load %arg4[%c1_43, %c0_44, %c0_45] : memref<4x31x1xf32, #tpu.memory_space<vmem>>, vector<1x31x1xf32>
    %75 = vector.shape_cast %74 : vector<1x31x1xf32> to vector<31x1xf32>
    %76 = vector.broadcast %75 : vector<31x1xf32> to vector<31x16xf32>
    %77 = arith.mulf %73, %76 : vector<31x16xf32>
    %78 = arith.addf %45, %77 : vector<31x16xf32>
    %c0_46 = arith.constant 0 : index
    %c2_47 = arith.constant 2 : index
    %79 = memref.load %arg2[%c0_46, %c2_47] : memref<6x4xf32, #tpu.memory_space<smem>>
    %80 = vector.broadcast %79 : f32 to vector<31x16xf32>
    %81 = arith.mulf %80, %1 : vector<31x16xf32>
    %c1_48 = arith.constant 1 : index
    %c2_49 = arith.constant 2 : index
    %82 = memref.load %arg2[%c1_48, %c2_49] : memref<6x4xf32, #tpu.memory_space<smem>>
    %83 = vector.broadcast %82 : f32 to vector<31x16xf32>
    %84 = arith.mulf %83, %3 : vector<31x16xf32>
    %85 = arith.addf %81, %84 : vector<31x16xf32>
    %c2_50 = arith.constant 2 : index
    %c2_51 = arith.constant 2 : index
    %86 = memref.load %arg2[%c2_50, %c2_51] : memref<6x4xf32, #tpu.memory_space<smem>>
    %87 = vector.broadcast %86 : f32 to vector<31x16xf32>
    %88 = arith.mulf %87, %5 : vector<31x16xf32>
    %89 = arith.addf %85, %88 : vector<31x16xf32>
    %c3_52 = arith.constant 3 : index
    %c2_53 = arith.constant 2 : index
    %90 = memref.load %arg2[%c3_52, %c2_53] : memref<6x4xf32, #tpu.memory_space<smem>>
    %91 = vector.broadcast %90 : f32 to vector<31x16xf32>
    %92 = arith.mulf %91, %7 : vector<31x16xf32>
    %93 = arith.addf %89, %92 : vector<31x16xf32>
    %c4_54 = arith.constant 4 : index
    %c2_55 = arith.constant 2 : index
    %94 = memref.load %arg2[%c4_54, %c2_55] : memref<6x4xf32, #tpu.memory_space<smem>>
    %95 = vector.broadcast %94 : f32 to vector<31x16xf32>
    %96 = arith.mulf %95, %9 : vector<31x16xf32>
    %97 = arith.addf %93, %96 : vector<31x16xf32>
    %c5_56 = arith.constant 5 : index
    %c2_57 = arith.constant 2 : index
    %98 = memref.load %arg2[%c5_56, %c2_57] : memref<6x4xf32, #tpu.memory_space<smem>>
    %99 = vector.broadcast %98 : f32 to vector<31x16xf32>
    %100 = arith.mulf %99, %11 : vector<31x16xf32>
    %101 = arith.addf %97, %100 : vector<31x16xf32>
    %c2_58 = arith.constant 2 : index
    %102 = memref.load %arg3[%c2_58] : memref<4xf32, #tpu.memory_space<smem>>
    %103 = vector.broadcast %102 : f32 to vector<31x16xf32>
    %104 = arith.addf %101, %103 : vector<31x16xf32>
    %cst_59 = arith.constant 0.000000e+00 : f32
    %105 = vector.broadcast %cst_59 : f32 to vector<31x16xf32>
    %106 = arith.maximumf %104, %105 : vector<31x16xf32>
    %c2_60 = arith.constant 2 : index
    %c0_61 = arith.constant 0 : index
    %c0_62 = arith.constant 0 : index
    %107 = vector.load %arg4[%c2_60, %c0_61, %c0_62] : memref<4x31x1xf32, #tpu.memory_space<vmem>>, vector<1x31x1xf32>
    %108 = vector.shape_cast %107 : vector<1x31x1xf32> to vector<31x1xf32>
    %109 = vector.broadcast %108 : vector<31x1xf32> to vector<31x16xf32>
    %110 = arith.mulf %106, %109 : vector<31x16xf32>
    %111 = arith.addf %78, %110 : vector<31x16xf32>
    %c0_63 = arith.constant 0 : index
    %c3_64 = arith.constant 3 : index
    %112 = memref.load %arg2[%c0_63, %c3_64] : memref<6x4xf32, #tpu.memory_space<smem>>
    %113 = vector.broadcast %112 : f32 to vector<31x16xf32>
    %114 = arith.mulf %113, %1 : vector<31x16xf32>
    %c1_65 = arith.constant 1 : index
    %c3_66 = arith.constant 3 : index
    %115 = memref.load %arg2[%c1_65, %c3_66] : memref<6x4xf32, #tpu.memory_space<smem>>
    %116 = vector.broadcast %115 : f32 to vector<31x16xf32>
    %117 = arith.mulf %116, %3 : vector<31x16xf32>
    %118 = arith.addf %114, %117 : vector<31x16xf32>
    %c2_67 = arith.constant 2 : index
    %c3_68 = arith.constant 3 : index
    %119 = memref.load %arg2[%c2_67, %c3_68] : memref<6x4xf32, #tpu.memory_space<smem>>
    %120 = vector.broadcast %119 : f32 to vector<31x16xf32>
    %121 = arith.mulf %120, %5 : vector<31x16xf32>
    %122 = arith.addf %118, %121 : vector<31x16xf32>
    %c3_69 = arith.constant 3 : index
    %c3_70 = arith.constant 3 : index
    %123 = memref.load %arg2[%c3_69, %c3_70] : memref<6x4xf32, #tpu.memory_space<smem>>
    %124 = vector.broadcast %123 : f32 to vector<31x16xf32>
    %125 = arith.mulf %124, %7 : vector<31x16xf32>
    %126 = arith.addf %122, %125 : vector<31x16xf32>
    %c4_71 = arith.constant 4 : index
    %c3_72 = arith.constant 3 : index
    %127 = memref.load %arg2[%c4_71, %c3_72] : memref<6x4xf32, #tpu.memory_space<smem>>
    %128 = vector.broadcast %127 : f32 to vector<31x16xf32>
    %129 = arith.mulf %128, %9 : vector<31x16xf32>
    %130 = arith.addf %126, %129 : vector<31x16xf32>
    %c5_73 = arith.constant 5 : index
    %c3_74 = arith.constant 3 : index
    %131 = memref.load %arg2[%c5_73, %c3_74] : memref<6x4xf32, #tpu.memory_space<smem>>
    %132 = vector.broadcast %131 : f32 to vector<31x16xf32>
    %133 = arith.mulf %132, %11 : vector<31x16xf32>
    %134 = arith.addf %130, %133 : vector<31x16xf32>
    %c3_75 = arith.constant 3 : index
    %135 = memref.load %arg3[%c3_75] : memref<4xf32, #tpu.memory_space<smem>>
    %136 = vector.broadcast %135 : f32 to vector<31x16xf32>
    %137 = arith.addf %134, %136 : vector<31x16xf32>
    %cst_76 = arith.constant 0.000000e+00 : f32
    %138 = vector.broadcast %cst_76 : f32 to vector<31x16xf32>
    %139 = arith.maximumf %137, %138 : vector<31x16xf32>
    %c3_77 = arith.constant 3 : index
    %c0_78 = arith.constant 0 : index
    %c0_79 = arith.constant 0 : index
    %140 = vector.load %arg4[%c3_77, %c0_78, %c0_79] : memref<4x31x1xf32, #tpu.memory_space<vmem>>, vector<1x31x1xf32>
    %141 = vector.shape_cast %140 : vector<1x31x1xf32> to vector<31x1xf32>
    %142 = vector.broadcast %141 : vector<31x1xf32> to vector<31x16xf32>
    %143 = arith.mulf %139, %142 : vector<31x16xf32>
    %144 = arith.addf %111, %143 : vector<31x16xf32>
    %cst_80 = arith.constant dense<0.000000e+00> : vector<16xf32>
    %145 = vector.multi_reduction <add>, %144, %cst_80 [0] : vector<31x16xf32> to vector<16xf32>
    %146 = vector.shape_cast %145 : vector<16xf32> to vector<1x16xf32>
    %cst_81 = arith.constant 0.000000e+00 : f32
    %147 = vector.broadcast %cst_81 : f32 to vector<1x16xf32>
    %148 = arith.subf %147, %146 : vector<1x16xf32>
    %c0_82 = arith.constant 0 : index
    %c0_83 = arith.constant 0 : index
    %149 = vector.load %arg5[%c0_82, %c0_83] : memref<1x16xf32, #tpu.memory_space<vmem>>, vector<1x16xf32>
    tpu.vector_store %arg5[%c0_82, %c0_83], %148 {strides = array<i32>} : memref<1x16xf32, #tpu.memory_space<vmem>>, vector<1x16xf32>,
    return
  }
  func.func @transform_0(%arg0: i32) -> (i32, i32, i32) {
    %c0_i32 = arith.constant 0 : i32
    %c0_i32_0 = arith.constant 0 : i32
    %c0_i32_1 = arith.constant 0 : i32
    return %c0_i32, %c0_i32_0, %arg0 : i32, i32, i32
  }
  func.func @transform_1(%arg0: i32) -> (i32, i32) {
    %c0_i32 = arith.constant 0 : i32
    %c0_i32_0 = arith.constant 0 : i32
    %c0_i32_1 = arith.constant 0 : i32
    return %c0_i32, %c0_i32_0 : i32, i32
  }
  func.func @transform_2(%arg0: i32) -> i32 {
    %c0_i32 = arith.constant 0 : i32
    %c0_i32_0 = arith.constant 0 : i32
    return %c0_i32 : i32
  }
  func.func @transform_3(%arg0: i32) -> (i32, i32, i32) {
    %c0_i32 = arith.constant 0 : i32
    %c0_i32_0 = arith.constant 0 : i32
    %c0_i32_1 = arith.constant 0 : i32
    %c0_i32_2 = arith.constant 0 : i32
    return %c0_i32, %c0_i32_0, %c0_i32_1 : i32, i32, i32
  }
  func.func @transform_4(%arg0: i32) -> (i32, i32) {
    %c0_i32 = arith.constant 0 : i32
    %c0_i32_0 = arith.constant 0 : i32
    return %c0_i32, %arg0 : i32, i32
  }
}

</mosaic_0001>

<bundles_post_ra>
// kernel: tpu_custom_call.1
= control target key start
LH: loop header
LB: loop body
LE: loop exit
PB: predicated region body
PF: predicated region fallthrough
CT: control target
= control target key end

     0   :  { %9 = vsyncpa [#allocation4], 0  ;;  %s1146_s0 = inlined_call_operand.vmem [shape: f32[3,32,16], index: 0, kind: input, shape index: {}]   ;;  %s1147_s1 = inlined_call_operand.vmem [shape: f32[6,4], index: 1, kind: input, shape index: {}]   ;;  %s1148_s2 = inlined_call_operand.vmem [shape: f32[4], index: 2, kind: input, shape index: {}]   ;;  %s1149_s3 = inlined_call_operand.vmem [shape: f32[4,31,1], index: 3, kind: input, shape index: {}]   ;;  %s1150_s4 = inlined_call_operand.hbm [shape: f32[1,16], index: 4, kind: output, shape index: {}]  }
   0x1   :  { %10 = vsyncpa [#allocation6], 0 }
   0x2   :  { %11 = vsyncpa [#allocation3], 0  ;;  %s20_s17 = sshll.u32 %s1147_s1, 4  ;;  %s30_s20 = sshll.u32 %s1148_s2, 4  ;;  %s21_s17 = int_to_ptr.vmem [resolvable:$true] %s20_s17  ;;  %s31_s20 = int_to_ptr.vmem [resolvable:$true] %s30_s20 }
   0x3   :  { %s558_s21 = scalar_lea.vmem %s21_s17, 128  ;;  %p563_p1 = scmp.lt.s32.totalorder %s21_s17, %s21_s17 }
   0x4   :  { %p559_p0 = scmp.ne.s32.totalorder %s21_s17, %s558_s21  ;;  %p564_p2 = scmp.lt.s32.totalorder %s558_s21, %s558_s21 }
   0x6   :  { %p565_p3 = por %p564_p2, %p563_p1 }
   0x8   :  { %p566_p4 = pnand %p565_p3, %p559_p0 }
   0xa   :  { %569 = shalt.err (!%p566_p4)
}
   0xb   :  { %s610_s22 = smov [#allocation2]   ;;  %s570_s23 = scalar_lea.vmem %s31_s20, 16 }
   0xc   :  { %23 = dma.vmem_to_smem %s21_s17, 128, %s610_s22, [#allocation4]  }
   0xd   :  { %p571_p5 = scmp.ne.s32.totalorder %s31_s20, %s570_s23  ;;  %p575_p6 = scmp.lt.s32.totalorder %s31_s20, %s31_s20 }
   0xe   :  { %p576_p7 = scmp.lt.s32.totalorder %s570_s23, %s570_s23 }
  0x10   :  { %p577_p8 = por %p576_p7, %p575_p6 }
  0x12   :  { %p578_p9 = pnand %p577_p8, %p571_p5 }
  0x14   :  { %581 = shalt.err (!%p578_p9)
}
  0x15   :  { %s611_s1 = smov [#allocation5]  }
  0x16   :  { %33 = dma.vmem_to_smem %s31_s20, 16, %s611_s1, [#allocation6]  }
  0x17   :  { %604 = dma.done.wait [#allocation4], 128  }
  0x18   :  { %605 = vsyncadd [#allocation4], 4294967168 }
  0x19   :  { %606 = dma.done.wait [#allocation6], 16  }
  0x1a   :  { %607 = vsyncadd [#allocation6], 4294967280 }
  0x1b   :  { %42 = sfence }
  0x1c   :  { %v526_v0 = vld [vmem:[%s1149_s3 + $0x20] sm:$0xff]  ;;  %v612_v2 = vmov 0   ;;  %v527_v3 = vld [vmem:[%s1149_s3 + $0x28] sm:$0xff]  ;;  %v528_v5 = vld [vmem:[%s1149_s3 + $0x30] sm:$0xff]  ;;  %s519_s27 = sld [smem:[#allocation2 + $0x1]]  ;;  %s69_s29 = sld [smem:[#allocation2]] }
  0x1d   :  { %v135_v1 = vld [vmem:[%s1149_s3] sm:$0xff]  ;;  %557 = vset.pattern.permute.xlu1 %v612_v2  ;;  %556 = vset.pattern.permute.xlu0 %v612_v2  ;;  %v136_v4 = vld [vmem:[%s1149_s3 + $0x8] sm:$0xff]  ;;  %v137_v6 = vld [vmem:[%s1149_s3 + $0x10] sm:$0xff]  ;;  %s520_s28 = sld [smem:[#allocation2 + $0x81]]  ;;  %s514_s30 = sld [smem:[#allocation2 + $0x80]]  ;;  %vm464_vm0 = vcmask 130048  }
  0x1e   :  { %240 = vperm.xlu1 %557, %v526_v0   ;;  %141 = vperm.xlu0 %556, %v135_v1   ;;  %v538_v7 = vld [vmem:[%s1149_s3 + $0x48] sm:$0xff]  ;;  %v537_v8 = vld [vmem:[%s1149_s3 + $0x40] sm:$0xff]  ;;  %v529_v9 = vld [vmem:[%s1149_s3 + $0x38] sm:$0x7f]  ;;  %s521_s5 = sld [smem:[#allocation2 + $0x101]]  ;;  %s515_s6 = sld [smem:[#allocation2 + $0x100]] }
  0x1f   :  { %v138_v10 = vld [vmem:[%s1149_s3 + $0x18] sm:$0x7f]  ;;  %v548_v11 = vld [vmem:[%s1149_s3 + $0x60] sm:$0xff]  ;;  %v539_v12 = vld [vmem:[%s1149_s3 + $0x50] sm:$0xff]  ;;  %s522_s7 = sld [smem:[#allocation2 + $0x181]]  ;;  %s725_s16 = sld [smem:[#allocation2 + $0x180]] }
  0x20   :  { %v540_v13 = vld [vmem:[%s1149_s3 + $0x58] sm:$0x7f]  ;;  %v549_v14 = vld [vmem:[%s1149_s3 + $0x68] sm:$0xff]  ;;  %v550_v16 = vld [vmem:[%s1149_s3 + $0x70] sm:$0xff]  ;;  %s523_s11 = sld [smem:[#allocation2 + $0x201]]  ;;  %s753_s22 = sld [smem:[#allocation2 + $0x200]] }
  0x21   :  { %v551_v15 = vld [vmem:[%s1149_s3 + $0x78] sm:$0x7f]  ;;  %v700_v19 = vld [vmem:[%s1146_s0] sm:$0xff]  ;;  %v710_v21 = vld [vmem:[%s1146_s0 + $0x8] sm:$0xff]  ;;  %s734_s19 = sld [smem:[#allocation2 + $0x281]]  ;;  %s755_s23 = sld [smem:[#allocation2 + $0x2]] }
  0x22   :  { %245 = vperm.xlu1 %557, %v527_v3   ;;  %146 = vperm.xlu0 %556, %v136_v4   ;;  %v693_v17 = vstv %s519_s27  ;;  %v705_v20 = vld [vmem:[%s1146_s0 + $0x1] sm:$0xff]  ;;  %v715_v22 = vld [vmem:[%s1146_s0 + $0x9] sm:$0xff]  ;;  %v721_v25 = vstv %s69_s29  ;;  %s764_s24 = sld [smem:[#allocation2 + $0x82]]  ;;  %s768_s25 = sld [smem:[#allocation2 + $0x280]]  ;;  %vm470_vm1 = vcmask 129024   ;;  %vm480_vm2 = vcmask 122880  }
  0x23   :  { %v695_v18 = vstv %s520_s28  ;;  %v169_v23 = vmul.f32 %v693_v17, %v700_v19  ;;  %v723_v26 = vstv %s514_s30  ;;  %v732_v28 = vld [vmem:[%s1146_s0 + $0x20] sm:$0xff]  ;;  %v170_v29 = vmul.f32 %v693_v17, %v710_v21  ;;  %v747_v33 = vld [vmem:[%s1146_s0 + $0x28] sm:$0xff]  ;;  %s812_s10 = sld [smem:[#allocation2 + $0x102]]  ;;  %s817_s3 = sld [smem:[#allocation5 + $0x1]] }
  0x24   :  { %v175_v24 = vmul.f32 %v695_v18, %v705_v20  ;;  %v727_v27 = vstv %s521_s5  ;;  %v176_v30 = vmul.f32 %v695_v18, %v715_v22  ;;  %v71_v31 = vmul.f32 %v721_v25, %v700_v19  ;;  %v762_v38 = vld [vmem:[%s1146_s0 + $0x21] sm:$0xff]  ;;  %v775_v42 = vld [vmem:[%s1146_s0 + $0x10] sm:$0xff]  ;;  %s857_s17 = sld [smem:[#allocation2 + $0x182]]  ;;  %s868_s18 = sld [smem:[#allocation5]] }
  0x25   :  { %v77_v32 = vmul.f32 %v723_v26, %v705_v20  ;;  %v185_v35 = vmul.f32 %v732_v28, %v727_v27  ;;  %v751_v36 = vstv %s515_s6  ;;  %v757_v37 = vstv %s522_s7  ;;  %v780_v43 = vld [vmem:[%s1146_s0 + $0x11] sm:$0xff]  ;;  %v785_v44 = vld [vmem:[%s1146_s0 + $0x40] sm:$0xff]  ;;  %s900_s1 = sld [smem:[#allocation2 + $0x282]]  ;;  %s926_s26 = sld [smem:[#allocation2 + $0x3]] }
  0x26   :  { %250 = vperm.xlu1 %557, %v528_v5   ;;  %151 = vperm.xlu0 %556, %v137_v6   ;;  %v179_v34 = vadd.f32 %v175_v24, %v169_v23  ;;  %v766_v39 = vstv %s523_s11  ;;  %v180_v40 = vadd.f32 %v176_v30, %v170_v29  ;;  %v186_v41 = vmul.f32 %v747_v33, %v727_v27  ;;  %v792_v47 = vld [vmem:[%s1146_s0 + $0x29] sm:$0xff]  ;;  %v826_v60 = vld [vmem:[%s1146_s0 + $0x41] sm:$0xff]  ;;  %v848_v6 = vld [vmem:[%s1146_s0 + $0x31] sm:$0xff]  ;;  %s906_s2 = sld [smem:[#allocation5 + $0x2]]  ;;  %s928_s27 = sld [smem:[#allocation2 + $0x83]] }
  0x27   :  { %v81_v45 = vadd.f32 %v77_v32, %v71_v31  ;;  %v87_v46 = vmul.f32 %v732_v28, %v751_v36  ;;  %v72_v48 = vmul.f32 %v721_v25, %v710_v21  ;;  %v78_v49 = vmul.f32 %v723_v26, %v715_v22  ;;  %v806_v53 = vld [vmem:[%s1146_s0 + $0x30] sm:$0xff]  ;;  %v833_v63 = vld [vmem:[%s1146_s0 + $0x48] sm:$0xff]  ;;  %s961_s6 = sld [smem:[#allocation2 + $0x103]] }
  0x28   :  { %v189_v50 = vadd.f32 %v185_v35, %v179_v34  ;;  %v195_v51 = vmul.f32 %v762_v38, %v757_v37  ;;  %v801_v52 = vstv %s725_s16  ;;  %v171_v54 = vmul.f32 %v693_v17, %v775_v42  ;;  %v873_v23 = vld [vmem:[%s1146_s0 + $0x49] sm:$0xff]  ;;  %s994_s12 = sld [smem:[#allocation2 + $0x183]] }
  0x29   :  { %v177_v55 = vmul.f32 %v695_v18, %v780_v43  ;;  %v815_v56 = vstv %s734_s19  ;;  %v205_v57 = vmul.f32 %v785_v44, %v766_v39  ;;  %v190_v58 = vadd.f32 %v186_v41, %v180_v40  ;;  %v886_v35 = vld [vmem:[%s1146_s0 + $0x50] sm:$0xff]  ;;  %s1027_s15 = sld [smem:[#allocation2 + $0x203]] }
  0x2a   :  { %344 = vperm.xlu1 %557, %v538_v7   ;;  %339 = vperm.xlu0 %556, %v537_v8   ;;  %v196_v59 = vmul.f32 %v792_v47, %v757_v37  ;;  %v91_v61 = vadd.f32 %v87_v46, %v81_v45  ;;  %v97_v62 = vmul.f32 %v762_v38, %v801_v52  ;;  %v838_v3 = vstv %s753_s22  ;;  %s1077_s16 = sld [smem:[#allocation5 + $0x3]] }
  0x2b   :  { %v82_v0 = vadd.f32 %v78_v49, %v72_v48  ;;  %v88_v1 = vmul.f32 %v747_v33, %v751_v36  ;;  %v199_v2 = vadd.f32 %v195_v51, %v189_v50  ;;  %v187_v4 = vmul.f32 %v806_v53, %v727_v27 }
  0x2c   :  { %v843_v5 = vstv %s755_s23  ;;  %v181_v7 = vadd.f32 %v177_v55, %v171_v54  ;;  %v73_v8 = vmul.f32 %v721_v25, %v775_v42  ;;  %v98_v29 = vmul.f32 %v792_v47, %v801_v52  ;;  %s893_s23 = sld [smem:[#allocation2 + $0x202]] }
  0x2d   :  { %v92_v24 = vadd.f32 %v88_v1, %v82_v0  ;;  %v209_v30 = vadd.f32 %v205_v57, %v199_v2  ;;  %v197_v31 = vmul.f32 %v848_v6, %v757_v37  ;;  %v269_v32 = vmul.f32 %v843_v5, %v710_v21  ;;  %v915_v0 = vld [vmem:[%s1146_s0 + $0x51] sm:$0xff] }
  0x2e   :  { %255 = vperm.xlu1 %557, %v529_v9   ;;  %156 = vperm.xlu0 %556, %v138_v10   ;;  %v79_v9 = vmul.f32 %v723_v26, %v780_v43  ;;  %v855_v10 = vstv %s764_s24  ;;  %v191_v40 = vadd.f32 %v187_v4, %v181_v7  ;;  %v89_v45 = vmul.f32 %v806_v53, %v751_v36 }
  0x2f   :  { %v275_v34 = vmul.f32 %v855_v10, %v715_v22  ;;  %v891_v46 = vstv %s812_s10  ;;  %v896_v48 = vstv %s817_s3  ;;  %v216_v50 = vmul.f32 %v873_v23, %v815_v56 }
  0x30   :  { %v83_v41 = vadd.f32 %v79_v9, %v73_v8  ;;  %1154 = vst [vmem:[#allocation11_spill] sm:$0xff] %v896_v48  ;;  %v102_v55 = vadd.f32 %v98_v29, %v92_v24  ;;  %v108_v57 = vmul.f32 %v833_v63, %v838_v3  ;;  %v201_v1 = vadd.f32 %v197_v31, %v191_v40 }
  0x31   :  { %v99_v4 = vmul.f32 %v848_v6, %v801_v52  ;;  %v920_v7 = vstv %s857_s17  ;;  %v268_v9 = vmul.f32 %v843_v5, %v700_v19  ;;  %v217_v29 = vmul.f32 %v915_v0, %v815_v56  ;;  %s613_s17 = smov [#allocation7]  }
  0x32   :  { %438 = vperm.xlu1 %557, %v548_v11   ;;  %349 = vperm.xlu0 %556, %v539_v12   ;;  %v215_v11 = vmul.f32 %v826_v60, %v815_v56  ;;  %v862_v12 = vstv %s768_s25  ;;  %v93_v2 = vadd.f32 %v89_v45, %v83_v41  ;;  %v295_v31 = vmul.f32 %v792_v47, %v920_v7  ;;  %v46_v45 = vld [vmem:[%s1146_s0 + $0x18] sm:$0x7f] }
  0x33   :  { %v117_v54 = vmul.f32 %v826_v60, %v862_v12  ;;  %v109_v40 = vmul.f32 %v886_v35, %v838_v3  ;;  %v945_v41 = vstv %s893_s23 }
  0x36   :  { %354 = vperm.xlu1 %557, %v540_v13   ;;  %443 = vperm.xlu0 %556, %v549_v14   ;;  %v200_v13 = vadd.f32 %v196_v59, %v190_v58  ;;  %v206_v14 = vmul.f32 %v833_v63, %v766_v39  ;;  %v219_v58 = vadd.f32 %v215_v11, %v209_v30 }
  0x37   :  { %v207_v59 = vmul.f32 %v886_v35, %v766_v39  ;;  %v274_v11 = vmul.f32 %v855_v10, %v705_v20 }
  0x38   :  { %v210_v49 = vadd.f32 %v206_v14, %v200_v13  ;;  %v931_v14 = vstv %s868_s18  ;;  %v936_v24 = vadd.f32 %v896_v48, %v219_v58  ;;  %s488_s18 = sshll.u32 %s613_s17, 4  ;;  %s489_s18 = int_to_ptr.vmem [resolvable:$true] %s488_s18 }
  0x39   :  { %s582_s19 = scalar_lea.vmem %s489_s18, 16  ;;  %s586_s20 = scalar_lea.vmem %s489_s18, 32 }
  0x3a   :  { %453 = vperm.xlu1 %557, %v551_v15   ;;  %448 = vperm.xlu0 %556, %v550_v16   ;;  %v101_v15 = vadd.f32 %v97_v62, %v91_v61  ;;  %v107_v16 = vmul.f32 %v785_v44, %v838_v3  ;;  %v279_v61 = vadd.f32 %v275_v34, %v269_v32  ;;  %p583_p10 = scmp.ne.s32.totalorder %s489_s18, %s582_s19  ;;  %p587_p11 = scmp.lt.s32.totalorder %s489_s18, %s489_s18 }
  0x3b   :  { %v285_v62 = vmul.f32 %v747_v33, %v891_v46  ;;  %v220_v8 = vadd.f32 %v216_v50, %v210_v49  ;;  %1155 = vst [vmem:[#allocation12_spill] sm:$0xff] %v936_v24  ;;  %v211_v32 = vadd.f32 %v207_v59, %v201_v1  ;;  %v103_v34 = vadd.f32 %v99_v4, %v93_v2  ;;  %v50_v49 = vld [vmem:[%s1146_s0 + $0x19] sm:$0x7f]  ;;  %p588_p12 = scmp.lt.s32.totalorder %s586_s20, %s582_s19 }
  0x3c   :  { %v111_v51 = vadd.f32 %v107_v16, %v101_v15  ;;  %v112_v15 = vadd.f32 %v108_v57, %v102_v55  ;;  %v118_v16 = vmul.f32 %v873_v23, %v862_v12  ;;  %v284_v55 = vmul.f32 %v732_v28, %v891_v46  ;;  %v985_v4 = vld [vmem:[%s1146_s0 + $0x39] sm:$0x7f] }
  0x3d   :  { %v289_v30 = vadd.f32 %v285_v62, %v279_v61  ;;  %v954_v50 = vadd.f32 %v896_v48, %v220_v8  ;;  %v970_v59 = vmul.f32 %v915_v0, %v862_v12  ;;  %v973_v61 = vstv %s906_s2  ;;  %v978_v62 = vld [vmem:[%s1146_s0 + $0x38] sm:$0x7f]  ;;  %p589_p13 = por %p588_p12, %p587_p11 }
  0x3e   :  { %v121_v13 = vadd.f32 %v117_v54, %v111_v51  ;;  %v957_v51 = vstv %s900_s1  ;;  %v278_v54 = vadd.f32 %v274_v11, %v268_v9  ;;  %v966_v58 = vadd.f32 %v118_v16, %v112_v15  ;;  %1159 = vst [vmem:[#allocation16_spill] sm:$0xff] %v973_v61  ;;  %v990_v8 = vld [vmem:[%s1146_s0 + $0x58] sm:$0x7f] }
  0x3f   :  { %1156 = vst [vmem:[#allocation13_spill] sm:$0xff] %v954_v50  ;;  %1158 = vst [vmem:[#allocation15_spill] sm:$0xff] %v970_v59  ;;  %v299_v1 = vadd.f32 %v295_v31, %v289_v30  ;;  %v305_v2 = vmul.f32 %v833_v63, %v945_v41  ;;  %v172_v9 = vmul.f32 %v693_v17, %v46_v45  ;;  %v372_v17 = vstv %s928_s27  ;;  %p590_p0 = pnand %p589_p13, %p583_p10 }
  0x40   :  { %v964_v57 = vadd.f32 %v931_v14, %v121_v13  ;;  %v178_v11 = vmul.f32 %v695_v18, %v50_v49  ;;  %v996_v13 = vadd.f32 %v217_v29, %v211_v32  ;;  %v998_v15 = vadd.f32 %v109_v40, %v103_v34  ;;  %v1015_v29 = vld [vmem:[%s1146_s0 + $0x59] sm:$0x7f]  ;;  %s1049_s0 = sld [smem:[#allocation2 + $0x283]] }
  0x41   :  { %v315_v16 = vmul.f32 %v873_v23, %v957_v51  ;;  %v294_v30 = vmul.f32 %v762_v38, %v920_v7  ;;  %v288_v31 = vadd.f32 %v284_v55, %v278_v54  ;;  %v304_v50 = vmul.f32 %v785_v44, %v945_v41 }
  0x42   :  { %1157 = vst [vmem:[#allocation14_spill] sm:$0xff] %v964_v57  ;;  %1160 = vst [vmem:[#allocation17_spill] sm:$0xff] %v996_v13  ;;  %v366_v57 = vstv %s926_s26  ;;  %v1010_v18 = vmul.f32 %v826_v60, %v957_v51  ;;  %v188_v32 = vmul.f32 %v978_v62, %v727_v27  ;;  %v198_v34 = vmul.f32 %v985_v4, %v757_v37 }
  0x43   :  { %1161 = vst [vmem:[#allocation18_spill] sm:$0xff] %v998_v15  ;;  %v1023_v40 = vmul.f32 %v990_v8, %v766_v39  ;;  %v309_v54 = vadd.f32 %v305_v2, %v299_v1  ;;  %v182_v55 = vadd.f32 %v178_v11, %v172_v9  ;;  %v74_v24 = vmul.f32 %v721_v25, %v46_v45 }
  0x44   :  { %v80_v61 = vmul.f32 %v723_v26, %v50_v49  ;;  %v367_v59 = vmul.f32 %v366_v57, %v700_v19  ;;  %v373_v27 = vmul.f32 %v372_v17, %v705_v20  ;;  %v270_v37 = vmul.f32 %v843_v5, %v775_v42 }
  0x45   :  { %v276_v39 = vmul.f32 %v855_v10, %v780_v43  ;;  %v298_v15 = vadd.f32 %v294_v30, %v288_v31  ;;  %v1037_v1 = vmul.f32 %v1015_v29, %v815_v56  ;;  %v90_v25 = vmul.f32 %v978_v62, %v751_v36 }
  0x46   :  { %v382_v26 = vstv %s961_s6  ;;  %v271_v2 = vmul.f32 %v843_v5, %v46_v45  ;;  %v277_v19 = vmul.f32 %v855_v10, %v50_v49  ;;  %v368_v20 = vmul.f32 %v366_v57, %v710_v21 }
  0x47   :  { %1162 = vst [vmem:[#allocation19_spill] sm:$0xff] %v1037_v1  ;;  %v374_v9 = vmul.f32 %v372_v17, %v715_v22  ;;  %v1046_v11 = vadd.f32 %v315_v16, %v309_v54  ;;  %v192_v48 = vadd.f32 %v188_v32, %v182_v55  ;;  %v84_v30 = vadd.f32 %v80_v61, %v74_v24 }
  0x48   :  { %v392_v31 = vstv %s994_s12  ;;  %v377_v56 = vadd.f32 %v373_v27, %v367_v59  ;;  %v383_v36 = vmul.f32 %v732_v28, %v382_v26  ;;  %v280_v1 = vadd.f32 %v276_v39, %v270_v37 }
  0x49   :  { %v286_v5 = vmul.f32 %v806_v53, %v891_v46  ;;  %v370_v10 = vmul.f32 %v366_v57, %v46_v45  ;;  %v376_v13 = vmul.f32 %v372_v17, %v50_v49  ;;  %v369_v21 = vmul.f32 %v366_v57, %v775_v42 }
  0x4a   :  { %v375_v22 = vmul.f32 %v372_v17, %v780_v43  ;;  %v281_v16 = vadd.f32 %v277_v19, %v271_v2  ;;  %v287_v24 = vmul.f32 %v978_v62, %v891_v46  ;;  %v378_v61 = vadd.f32 %v374_v9, %v368_v20 }
  0x4b   :  { %v384_v32 = vmul.f32 %v747_v33, %v382_v26  ;;  %v94_v59 = vadd.f32 %v90_v25, %v84_v30  ;;  %v100_v28 = vmul.f32 %v985_v4, %v801_v52  ;;  %v110_v54 = vmul.f32 %v990_v8, %v838_v3 }
  0x4c   :  { %v402_v45 = vstv %s1027_s15  ;;  %v387_v49 = vadd.f32 %v383_v36, %v377_v56  ;;  %v393_v42 = vmul.f32 %v762_v38, %v392_v31  ;;  %v290_v43 = vadd.f32 %v286_v5, %v280_v1 }
  0x4d   :  { %v296_v57 = vmul.f32 %v848_v6, %v920_v7  ;;  %v380_v33 = vadd.f32 %v376_v13, %v370_v10  ;;  %v386_v55 = vmul.f32 %v978_v62, %v382_v26  ;;  %v379_v52 = vadd.f32 %v375_v22, %v369_v21 }
  0x4e   :  { %v385_v27 = vmul.f32 %v806_v53, %v382_v26  ;;  %v291_v3 = vadd.f32 %v287_v24, %v281_v16  ;;  %v297_v37 = vmul.f32 %v985_v4, %v920_v7  ;;  %v388_v38 = vadd.f32 %v384_v32, %v378_v61 }
  0x4f   :  { %v394_v39 = vmul.f32 %v792_v47, %v392_v31  ;;  %v308_v1 = vadd.f32 %v304_v50, %v298_v15  ;;  %v202_v25 = vadd.f32 %v198_v34, %v192_v48  ;;  %v104_v2 = vadd.f32 %v100_v28, %v94_v59  ;;  %v1163_v59 = vld [vmem:[#allocation17_spill] sm:$0xff]  ;;  %v1164_v28 = vld [vmem:[#allocation11_spill] sm:$0xff] }
  0x50   :  { %v412_v19 = vstv %s1049_s0  ;;  %v397_v20 = vadd.f32 %v393_v42, %v387_v49  ;;  %v403_v13 = vmul.f32 %v785_v44, %v402_v45  ;;  %v300_v62 = vadd.f32 %v296_v57, %v290_v43  ;;  %v1165_v49 = vld [vmem:[#allocation18_spill] sm:$0xff]  ;;  %v1166_v42 = vld [vmem:[#allocation15_spill] sm:$0xff] }
  0x51   :  { %v306_v53 = vmul.f32 %v886_v35, %v945_v41  ;;  %v390_v7 = vadd.f32 %v386_v55, %v380_v33  ;;  %v396_v47 = vmul.f32 %v985_v4, %v392_v31  ;;  %v389_v50 = vadd.f32 %v385_v27, %v379_v52 }
  0x52   :  { %v395_v48 = vmul.f32 %v848_v6, %v392_v31  ;;  %v301_v15 = vadd.f32 %v297_v37, %v291_v3  ;;  %v307_v34 = vmul.f32 %v990_v8, %v945_v41  ;;  %v398_v30 = vadd.f32 %v394_v39, %v388_v38  ;;  %v1168_v37 = vld [vmem:[#allocation16_spill] sm:$0xff] }
  0x53   :  { %v404_v44 = vmul.f32 %v833_v63, %v402_v45  ;;  %v318_v56 = vadd.f32 %v1010_v18, %v308_v1  ;;  %v212_v36 = vadd.f32 %v1023_v40, %v202_v25  ;;  %v114_v5 = vadd.f32 %v110_v54, %v104_v2  ;;  %v1169_v2 = vld [vmem:[#allocation12_spill] sm:$0xff] }
  0x54   :  { %v120_v10 = vmul.f32 %v1015_v29, %v862_v12  ;;  %v407_v21 = vadd.f32 %v403_v13, %v397_v20  ;;  %v413_v4 = vmul.f32 %v826_v60, %v412_v19  ;;  %v310_v22 = vadd.f32 %v306_v53, %v300_v62  ;;  %v1170_v13 = vld [vmem:[#allocation14_spill] sm:$0xff] }
  0x55   :  { %v316_v6 = vmul.f32 %v915_v0, %v957_v51  ;;  %v400_v63 = vadd.f32 %v396_v47, %v390_v7  ;;  %v406_v18 = vmul.f32 %v990_v8, %v402_v45  ;;  %v399_v40 = vadd.f32 %v395_v48, %v389_v50  ;;  %v1167_v8 = vld [vmem:[#allocation19_spill] sm:$0xff]  ;;  %v1171_v47 = vld [vmem:[#allocation13_spill] sm:$0xff] }
  0x56   :  { %v405_v16 = vmul.f32 %v886_v35, %v402_v45  ;;  %v311_v24 = vadd.f32 %v307_v34, %v301_v15  ;;  %v317_v12 = vmul.f32 %v1015_v29, %v957_v51  ;;  %v408_v60 = vadd.f32 %v404_v44, %v398_v30 }
  0x57   :  { %v414_v61 = vmul.f32 %v873_v23, %v412_v19  ;;  %v128_v32 = vadd.f32 %v931_v14, %v966_v58  ;;  %v227_v54 = vadd.f32 %v1164_v28, %v1163_v59  ;;  %v123_v43 = vadd.f32 %v1166_v42, %v1165_v49 }
  0x58   :  { %v222_v57 = vadd.f32 %v1167_v8, %v212_v36  ;;  %v124_v33 = vadd.f32 %v120_v10, %v114_v5  ;;  %v422_v35 = vstv %s1077_s16  ;;  %v417_v45 = vadd.f32 %v413_v4, %v407_v21 }
  0x59   :  { %v320_v55 = vadd.f32 %v316_v6, %v310_v22  ;;  %v410_v27 = vadd.f32 %v406_v18, %v400_v63  ;;  %v416_v23 = vmul.f32 %v1015_v29, %v412_v19  ;;  %v409_v3 = vadd.f32 %v405_v16, %v399_v40 }
  0x5a   :  { %v415_v58 = vmul.f32 %v915_v0, %v412_v19  ;;  %v325_v38 = vadd.f32 %v1168_v37, %v1046_v11  ;;  %v324_v39 = vadd.f32 %v1168_v37, %v318_v56  ;;  %v321_v1 = vadd.f32 %v317_v12, %v311_v24 }
  0x5b   :  { %v418_v25 = vadd.f32 %v414_v61, %v408_v60  ;;  %v229_v20 = vmax.f32 %v1169_v2, 0.0  ;;  %v131_v62 = vmax.f32 %v1170_v13, 0.0  ;;  %v129_v53 = vadd.f32 %v931_v14, %v123_v43 }
  0x5c   :  { %v228_v7 = vadd.f32 %v1164_v28, %v222_v57  ;;  %v230_v29 = vmax.f32 %v1171_v47, 0.0  ;;  %v132_v50 = vmax.f32 %v128_v32, 0.0  ;;  %v130_v0 = vadd.f32 %v931_v14, %v124_v33 }
  0x5d   :  { %v423_v19 = vadd.f32 %v422_v35, %v417_v45  ;;  %v231_v48 = vmax.f32 %v227_v54, 0.0  ;;  %v326_v34 = vadd.f32 %v1168_v37, %v320_v55  ;;  %v420_v30 = vadd.f32 %v416_v23, %v410_v27 }
  0x5e   :  { %v419_v44 = vadd.f32 %v415_v58, %v409_v3  ;;  %v329_v56 = vmax.f32 %v325_v38, 0.0  ;;  %v328_v36 = vmax.f32 %v324_v39, 0.0  ;;  %v327_v5 = vadd.f32 %v1168_v37, %v321_v1 }
  0x5f   :  { %v424_v10 = vadd.f32 %v422_v35, %v418_v25  ;;  %v133_v22 = vmax.f32 %v129_v53, 0.0  ;;  %v232_v6 = vmax.f32 %v228_v7, 0.0  ;;  %v134_v18 = vmax.f32 %v130_v0, 0.0 }
  0x60   :  { %v427_v40 = vmax.f32 %v423_v19, 0.0  ;;  %v330_v12 = vmax.f32 %v326_v34, 0.0  ;;  %v426_v60 = vadd.f32 %v422_v35, %v420_v30  ;;  %v425_v61 = vadd.f32 %v422_v35, %v419_v44 }
  0x61   :  { %v331_v28 = vmax.f32 %v327_v5, 0.0  ;;  %v428_v54 = vmax.f32 %v424_v10, 0.0 }
  0x62   :  { %v430_v45 = vmax.f32 %v426_v60, 0.0  ;;  %v429_v55 = vmax.f32 %v425_v61, 0.0 }
  0x9d   :  { %v1067_v46 = vpop.permute.xlu1 %240  ;;  %v1069_v17 = vpop.permute.xlu0 %141 }
  0x9e   :  { %v258_v21 = vmul.f32 %v1067_v46, %v229_v20  ;;  %v159_v4 = vmul.f32 %v1069_v17, %v131_v62 }
  0xa0   :  { %v262_v46 = vadd.f32 %v258_v21, %v159_v4 }
  0xa1   :  { %v1082_v26 = vpop.permute.xlu1 %245  ;;  %v1084_v9 = vpop.permute.xlu0 %146 }
  0xa2   :  { %v259_v14 = vmul.f32 %v1082_v26, %v230_v29  ;;  %v160_v63 = vmul.f32 %v1084_v9, %v132_v50 }
  0xa4   :  { %v263_v42 = vadd.f32 %v259_v14, %v160_v63 }
  0xa5   :  { %v1098_v41 = vpop.permute.xlu1 %250  ;;  %v1100_v31 = vpop.permute.xlu0 %151 }
  0xa6   :  { %v260_v17 = vmul.f32 %v1098_v41, %v231_v48  ;;  %v161_v49 = vmul.f32 %v1100_v31, %v133_v22 }
  0xa8   :  { %v264_v23 = vadd.f32 %v260_v17, %v161_v49 }
  0xa9   :  { %v345_v52 = vpop.permute.xlu1 %344  ;;  %v340_v51 = vpop.permute.xlu0 %339 }
  0xaa   :  { %v358_v32 = vmul.f32 %v345_v52, %v329_v56  ;;  %v357_v59 = vmul.f32 %v340_v51, %v328_v36 }
  0xac   :  { %v362_v27 = vadd.f32 %v358_v32, %v263_v42  ;;  %v361_v35 = vadd.f32 %v357_v59, %v262_v46 }
  0xad   :  { %v256_v11 = vpop.permute.xlu1 %255  ;;  %v157_v15 = vpop.permute.xlu0 %156 }
  0xae   :  { %v261_v26 = vmul.f32 %v256_v11, %v232_v6  ;;  %v162_v43 = vmul.f32 %v157_v15, %v134_v18 }
  0xb0   :  { %v265_v3 = vadd.f32 %v261_v26, %v162_v43 }
  0xb1   :  { %v439_v16 = vpop.permute.xlu1 %438  ;;  %v350_v24 = vpop.permute.xlu0 %349 }
  0xb2   :  { %v456_v9 = vmul.f32 %v439_v16, %v427_v40  ;;  %v359_v8 = vmul.f32 %v350_v24, %v330_v12 }
  0xb4   :  { %v460_v58 = vadd.f32 %v456_v9, %v361_v35  ;;  %v363_v41 = vadd.f32 %v359_v8, %v264_v23 }
  0xb5   :  { %v355_v57 = vpop.permute.xlu1 %354  ;;  %v444_v33 = vpop.permute.xlu0 %443 }
  0xb6   :  { %v360_v52 = vmul.f32 %v355_v57, %v331_v28  ;;  %v457_v51 = vmul.f32 %v444_v33, %v428_v54  ;;  %v465_v20 = vsel %vm464_vm0, %v460_v58, 0.0 }
  0xb8   :  { %v461_v37 = vadd.f32 %v457_v51, %v362_v27  ;;  %v364_v39 = vadd.f32 %v360_v52, %v265_v3 }
  0xb9   :  { %v454_v31 = vpop.permute.xlu1 %453  ;;  %v449_v38 = vpop.permute.xlu0 %448 }
  0xba   :  { %v466_v1 = vsel %vm464_vm0, %v461_v37, 0.0  ;;  %v459_v25 = vmul.f32 %v454_v31, %v430_v45  ;;  %v458_v2 = vmul.f32 %v449_v38, %v429_v55 }
  0xbb   :  { %v467_v53 = vadd.f32 %v466_v1, %v465_v20 }
  0xbc   :  { %v463_v13 = vadd.f32 %v459_v25, %v364_v39  ;;  %v462_v62 = vadd.f32 %v458_v2, %v363_v41 }
  0xbe   :  { %v468_v7 = vsel %vm464_vm0, %v462_v62, 0.0  ;;  %v471_v29 = vsel %vm470_vm1, %v463_v13, 0.0 }
  0xbf   :  { %v469_v47 = vadd.f32 %v468_v7, %v467_v53 }
  0xc1   :  { %v472_v50 = vadd.f32 %v471_v29, %v469_v47 }
  0xc3   :  { %v473_v0 = vrot.slane %v472_v50, 4 }
  0xc5   :  { %v474_v19 = vadd.f32 %v473_v0, %v472_v50 }
  0xc7   :  { %v475_v48 = vrot.slane %v474_v19, 2 }
  0xc9   :  { %v476_v11 = vadd.f32 %v475_v48, %v474_v19 }
  0xcb   :  { %v477_v15 = vrot.slane %v476_v11, 1 }
  0xcd   :  { %v478_v34 = vadd.f32 %v477_v15, %v476_v11 }
  0xcf   :  { %v479_v30 = vsub.f32 0.0, %v478_v34 }
  0xd1   :  { %481 = vst.msk [vmem:[#allocation7] sm:$0x1] %vm480_vm2, %v479_v30 }
  0xd2   :  { %593 = shalt.err (!%p590_p0)
}
  0xd3   :  { %s594_s23 = scalar_lea.hbm %s1150_s4, 16 }
  0xd4   :  { %p595_p1 = scmp.ne.s32.totalorder %s1150_s4, %s594_s23  ;;  %p598_p2 = scmp.lt.u32.totalorder %s594_s23, %s1150_s4 }
  0xd6   :  { %p600_p3 = pnand %p598_p2, %p595_p1 }
  0xd8   :  { %603 = shalt.err (!%p600_p3)
}
  0xd9   :  { %491 = dma.vmem_to_hbm [thread:$0]  %s489_s18, 16, %s1150_s4, [#allocation3]  }
  0xda   :  { %608 = dma.done.wait [#allocation3], 16  }
  0xdb   :  { %609 = vsyncadd [#allocation3], 4294967280 }
  0xdc   :  { %495 = vsyncpa [#allocation3], 1 }
  0xdd   :  { %496 = vsyncpa [#allocation4], 1 }
  0xde   :  { %497 = vsyncpa [#allocation6], 1 }

</bundles_post_ra>
